<compile_context>
chip_gen: v6e
topology: v6e:2x2x1
jax: 0.10.0
libtpu: 0.0.40
codegen_flags: <defaults>
</compile_context>

<pallas_src>
import functools

import jax
import jax.numpy as jnp
from jax.experimental import pallas as pl
from jax.experimental.pallas import tpu as pltpu

LANE = 128


def _round_up(n, m):
    return (n + m - 1) // m * m


def _actor_critic_kernel(x_ref, w1_ref, b1_ref, w2_ref, b2_ref,
                         wh_ref, bh_ref, probs_ref, value_ref, *, action_size):
    w_dtype = w1_ref.dtype
    x = x_ref[...].astype(w_dtype)

    # Shared MLP trunk: Linear -> ReLU -> Linear -> ReLU (MXU + VPU),
    # f32 accumulation, bf16 (or f32) operands.
    h1 = jnp.dot(x, w1_ref[...], preferred_element_type=jnp.float32) + b1_ref[...]
    h1 = jnp.maximum(h1, 0.0)
    h2 = jnp.dot(h1.astype(w_dtype), w2_ref[...],
                 preferred_element_type=jnp.float32) + b2_ref[...]
    h2 = jnp.maximum(h2, 0.0)

    # Fused actor+critic head: columns [0:A] are actor logits, column A is the
    # critic value, remaining (padded) columns are zero.
    head = jnp.dot(h2.astype(w_dtype), wh_ref[...],
                   preferred_element_type=jnp.float32) + bh_ref[...]

    lane = jax.lax.broadcasted_iota(jnp.int32, head.shape, dimension=1)

    # Softmax over the actor lanes only; pad lanes masked to a huge negative
    # so exp() underflows to exactly 0 and they drop out of max/sum.
    logits = jnp.where(lane < action_size, head, -1e30)
    m = jnp.max(logits, axis=-1, keepdims=True)
    e = jnp.exp(logits - m)
    denom = jnp.sum(e, axis=-1, keepdims=True)
    probs = e / denom                      # exact divide: rows sum to 1 (f32)

    probs_ref[...] = probs[:, :action_size].astype(probs_ref.dtype)
    value_ref[...] = head[:, action_size:action_size + 1].astype(value_ref.dtype)


def pack_params(params, *, weight_dtype=jnp.bfloat16):
    """Pad hidden/head dims to 128 lanes, fuse the two heads, cast weights.

    Weights -> `weight_dtype` (default bf16, the native MXU operand type);
    biases stay f32.  x is NOT padded or cast here -- pass it to
    `mlp_actor_critic` in whatever dtype it already lives in (bf16 halves the
    dominant input HBM stream).
    """
    w1, b1, w2, b2, wa, ba, wc, bc = params
    state_size, hidden = w1.shape
    action_size = wa.shape[1]

    h_pad = _round_up(hidden, LANE)
    head_pad = _round_up(action_size + 1, LANE)

    w1p = (jnp.zeros((state_size, h_pad), jnp.float32)
           .at[:, :hidden].set(w1).astype(weight_dtype))
    b1p = jnp.zeros((1, h_pad), jnp.float32).at[:, :hidden].set(b1)
    w2p = (jnp.zeros((h_pad, h_pad), jnp.float32)
           .at[:hidden, :hidden].set(w2).astype(weight_dtype))
    b2p = jnp.zeros((1, h_pad), jnp.float32).at[:, :hidden].set(b2)
    whp = (jnp.zeros((h_pad, head_pad), jnp.float32)
           .at[:hidden, :action_size].set(wa)
           .at[:hidden, action_size:action_size + 1].set(wc)
           .astype(weight_dtype))
    bhp = (jnp.zeros((1, head_pad), jnp.float32)
           .at[:, :action_size].set(ba)
           .at[:, action_size:action_size + 1].set(bc))
    return (w1p, b1p, w2p, b2p, whp, bhp), (state_size, hidden, action_size)


def mlp_actor_critic(x, packed_params, dims, *, tile_b=2048):
    """x: (B, state_size).  Returns (probs (B, A) f32, value (B, 1) f32)."""
    w1p, b1p, w2p, b2p, whp, bhp = packed_params
    state_size, _hidden, action_size = dims
    batch = x.shape[0]

    h_pad = w2p.shape[0]
    head_pad = whp.shape[1]

    # Batch tile: multiple of 8 sublanes; 2048 rows of (x + a few f32x128
    # intermediates + narrow outputs) is only a few MiB even double-buffered,
    # comfortably inside v7x's 64 MiB VMEM while large enough (>1 MiB blocks)
    # to sit near the HBM roofline.  Tiny demo batches shrink the tile.
    tile_b = _round_up(max(8, min(tile_b, _round_up(batch, 8))), 8)
    grid = (pl.cdiv(batch, tile_b),)   # partial final block handled by Pallas

    kernel = functools.partial(_actor_critic_kernel, action_size=action_size)

    itemsize_x = jnp.dtype(x.dtype).itemsize
    itemsize_w = jnp.dtype(w1p.dtype).itemsize
    flops = 2 * batch * (state_size * h_pad + h_pad * h_pad + h_pad * head_pad)
    bytes_accessed = (batch * state_size * itemsize_x                 # x in
                      + batch * (action_size + 1) * 4                 # outs
                      + (state_size * h_pad + h_pad * h_pad
                         + h_pad * head_pad) * itemsize_w             # weights
                      + (2 * h_pad + head_pad) * 4)                   # biases
    cost = pl.CostEstimate(flops=int(flops),
                           transcendentals=int(batch * head_pad),
                           bytes_accessed=int(bytes_accessed))

    # Note: on v7x one could try pltpu.CORE_PARALLEL on the batch axis to
    # force 2-TensorCore sharding; "parallel" is the portable/safe choice.
    probs, value = pl.pallas_call(
        kernel,
        out_shape=(jax.ShapeDtypeStruct((batch, action_size), jnp.float32),
                   jax.ShapeDtypeStruct((batch, 1), jnp.float32)),
        grid=grid,
        in_specs=[
            pl.BlockSpec((tile_b, state_size), lambda i: (i, 0)),  # x (tiled)
            pl.BlockSpec((state_size, h_pad), lambda i: (0, 0)),   # W1 (resident)
            pl.BlockSpec((1, h_pad), lambda i: (0, 0)),            # b1
            pl.BlockSpec((h_pad, h_pad), lambda i: (0, 0)),        # W2
            pl.BlockSpec((1, h_pad), lambda i: (0, 0)),            # b2
            pl.BlockSpec((h_pad, head_pad), lambda i: (0, 0)),     # fused head W
            pl.BlockSpec((1, head_pad), lambda i: (0, 0)),         # fused head b
        ],
        out_specs=(pl.BlockSpec((tile_b, action_size), lambda i: (i, 0)),
                   pl.BlockSpec((tile_b, 1), lambda i: (i, 0))),
        compiler_params=pltpu.CompilerParams(
            dimension_semantics=("parallel",),
            vmem_limit_bytes=32 << 20),
        cost_estimate=cost,
    )(x, w1p, b1p, w2p, b2p, whp, bhp)

    return probs, value


def _orthogonal(key, out_features, in_features):
    """Deterministic orthogonal init (same spirit as nn.init.orthogonal_)."""
    n = max(out_features, in_features)
    a = jax.random.normal(key, (n, n), dtype=jnp.float32)
    q, r = jnp.linalg.qr(a)
    q = q * jnp.sign(jnp.diagonal(r))        # make the decomposition unique
    return q[:out_features, :in_features]    # (out, in), rows/cols orthonormal


def init_params(key, state_size, action_size, hidden=64):
    k1, k2, k3, k4 = jax.random.split(key, 4)
    # Stored pre-transposed as (in, out); biases as (1, out) rows of zeros.
    w1 = _orthogonal(k1, hidden, state_size).T          # (state, 64)
    b1 = jnp.zeros((1, hidden), jnp.float32)
    w2 = _orthogonal(k2, hidden, hidden).T               # (64, 64)
    b2 = jnp.zeros((1, hidden), jnp.float32)
    wa = _orthogonal(k3, action_size, hidden).T          # (64, action)
    ba = jnp.zeros((1, action_size), jnp.float32)
    wc = _orthogonal(k4, 1, hidden).T                    # (64, 1)
    bc = jnp.zeros((1, 1), jnp.float32)
    return (w1, b1, w2, b2, wa, ba, wc, bc)


def _reference(x, params):
    """Pure-JAX f32 reference for correctness checking."""
    w1, b1, w2, b2, wa, ba, wc, bc = params
    h = jnp.maximum(x @ w1 + b1, 0.0)
    h = jnp.maximum(h @ w2 + b2, 0.0)
    logits = h @ wa + ba
    probs = jax.nn.softmax(logits, axis=-1)
    value = h @ wc + bc
    return probs, value


if __name__ == "__main__":
    state_size = 32
    action_size = 8
    batch = 8

    key = jax.random.PRNGKey(0)
    k_param, k_x = jax.random.split(key)

    raw_params = init_params(k_param, state_size, action_size)
    packed_params, dims = pack_params(raw_params)          # bf16 weights
    x = jax.random.normal(k_x, (batch, state_size), dtype=jnp.float32)

    probs, value = mlp_actor_critic(x, packed_params, dims)
    probs = jax.block_until_ready(probs)
    value = jax.block_until_ready(value)

    ref_probs, ref_value = _reference(x, raw_params)
    assert probs.shape == (batch, action_size)
    assert value.shape == (batch, 1)
    # Row normalization is exact (f32 softmax + exact divide).
    assert jnp.allclose(jnp.sum(probs, axis=-1), 1.0, atol=1e-5)
    # Weights are bf16 in the kernel, so compare against the f32 reference at
    # bf16-level tolerance (64-wide MLP, f32 accumulation: error << 1e-2 rel).
    assert jnp.allclose(value, ref_value, atol=3e-2, rtol=3e-2)
    assert jnp.allclose(probs, ref_probs, atol=3e-2, rtol=0)

    print("KERNEL_OK")
</pallas_src>

<mosaic_0001>
module attributes {stable_mosaic.version = 11 : i64} {
  func.func @_actor_critic_kernel(%arg0: i32, %arg1: memref<8x32xf32, #tpu.memory_space<vmem>>, %arg2: memref<32x128xbf16, #tpu.memory_space<vmem>>, %arg3: memref<1x128xf32, #tpu.memory_space<vmem>>, %arg4: memref<128x128xbf16, #tpu.memory_space<vmem>>, %arg5: memref<1x128xf32, #tpu.memory_space<vmem>>, %arg6: memref<128x128xbf16, #tpu.memory_space<vmem>>, %arg7: memref<1x128xf32, #tpu.memory_space<vmem>>, %arg8: memref<8x8xf32, #tpu.memory_space<vmem>>, %arg9: memref<8x1xf32, #tpu.memory_space<vmem>>) attributes {dimension_semantics = [#tpu.dimension_semantics<parallel>], iteration_bounds = array<i64: 1>, scalar_prefetch = 0 : i64, scratch_operands = 0 : i64, tpu.core_type = #tpu.core_type<tc>, window_params = [{transform_indices = @transform_0, window_bounds = array<i64: 8, 32>}, {pipeline_mode = #tpu.pipeline_mode<synchronous>, transform_indices = @transform_1, window_bounds = array<i64: 32, 128>}, {pipeline_mode = #tpu.pipeline_mode<synchronous>, transform_indices = @transform_2, window_bounds = array<i64: 1, 128>}, {pipeline_mode = #tpu.pipeline_mode<synchronous>, transform_indices = @transform_3, window_bounds = array<i64: 128, 128>}, {pipeline_mode = #tpu.pipeline_mode<synchronous>, transform_indices = @transform_4, window_bounds = array<i64: 1, 128>}, {pipeline_mode = #tpu.pipeline_mode<synchronous>, transform_indices = @transform_5, window_bounds = array<i64: 128, 128>}, {pipeline_mode = #tpu.pipeline_mode<synchronous>, transform_indices = @transform_6, window_bounds = array<i64: 1, 128>}, {transform_indices = @transform_7, window_bounds = array<i64: 8, 8>}, {transform_indices = @transform_8, window_bounds = array<i64: 8, 1>}]} {
    %c0 = arith.constant 0 : index
    %c0_0 = arith.constant 0 : index
    %0 = vector.load %arg1[%c0, %c0_0] : memref<8x32xf32, #tpu.memory_space<vmem>>, vector<8x32xf32>
    %1 = arith.truncf %0 : vector<8x32xf32> to vector<8x32xbf16>
    %c0_1 = arith.constant 0 : index
    %c0_2 = arith.constant 0 : index
    %2 = vector.load %arg2[%c0_1, %c0_2] : memref<32x128xbf16, #tpu.memory_space<vmem>>, vector<32x128xbf16>
    %cst = arith.constant dense<0.000000e+00> : vector<8x128xf32>
    %3 = tpu.matmul %1, %2, %cst {dimension_numbers = #tpu.dot_dimension_numbers<[1], [0], [0], [1], [0, 0, 1, 1], [], []>} : vector<8x32xbf16>, vector<32x128xbf16>, vector<8x128xf32> -> vector<8x128xf32>
    %c0_3 = arith.constant 0 : index
    %c0_4 = arith.constant 0 : index
    %4 = vector.load %arg3[%c0_3, %c0_4] : memref<1x128xf32, #tpu.memory_space<vmem>>, vector<1x128xf32>
    %5 = vector.broadcast %4 : vector<1x128xf32> to vector<8x128xf32>
    %6 = arith.addf %3, %5 : vector<8x128xf32>
    %cst_5 = arith.constant 0.000000e+00 : f32
    %7 = vector.broadcast %cst_5 : f32 to vector<8x128xf32>
    %8 = arith.maximumf %6, %7 : vector<8x128xf32>
    %9 = arith.truncf %8 : vector<8x128xf32> to vector<8x128xbf16>
    %c0_6 = arith.constant 0 : index
    %c0_7 = arith.constant 0 : index
    %10 = vector.load %arg4[%c0_6, %c0_7] : memref<128x128xbf16, #tpu.memory_space<vmem>>, vector<128x128xbf16>
    %cst_8 = arith.constant dense<0.000000e+00> : vector<8x128xf32>
    %11 = tpu.matmul %9, %10, %cst_8 {dimension_numbers = #tpu.dot_dimension_numbers<[1], [0], [0], [1], [0, 0, 1, 1], [], []>} : vector<8x128xbf16>, vector<128x128xbf16>, vector<8x128xf32> -> vector<8x128xf32>
    %c0_9 = arith.constant 0 : index
    %c0_10 = arith.constant 0 : index
    %12 = vector.load %arg5[%c0_9, %c0_10] : memref<1x128xf32, #tpu.memory_space<vmem>>, vector<1x128xf32>
    %13 = vector.broadcast %12 : vector<1x128xf32> to vector<8x128xf32>
    %14 = arith.addf %11, %13 : vector<8x128xf32>
    %cst_11 = arith.constant 0.000000e+00 : f32
    %15 = vector.broadcast %cst_11 : f32 to vector<8x128xf32>
    %16 = arith.maximumf %14, %15 : vector<8x128xf32>
    %17 = arith.truncf %16 : vector<8x128xf32> to vector<8x128xbf16>
    %c0_12 = arith.constant 0 : index
    %c0_13 = arith.constant 0 : index
    %18 = vector.load %arg6[%c0_12, %c0_13] : memref<128x128xbf16, #tpu.memory_space<vmem>>, vector<128x128xbf16>
    %cst_14 = arith.constant dense<0.000000e+00> : vector<8x128xf32>
    %19 = tpu.matmul %17, %18, %cst_14 {dimension_numbers = #tpu.dot_dimension_numbers<[1], [0], [0], [1], [0, 0, 1, 1], [], []>} : vector<8x128xbf16>, vector<128x128xbf16>, vector<8x128xf32> -> vector<8x128xf32>
    %c0_15 = arith.constant 0 : index
    %c0_16 = arith.constant 0 : index
    %20 = vector.load %arg7[%c0_15, %c0_16] : memref<1x128xf32, #tpu.memory_space<vmem>>, vector<1x128xf32>
    %21 = vector.broadcast %20 : vector<1x128xf32> to vector<8x128xf32>
    %22 = arith.addf %19, %21 : vector<8x128xf32>
    %23 = tpu.iota {dimensions = array<i32: 1>} : vector<8x128xi32>
    %c8_i32 = arith.constant 8 : i32
    %24 = vector.broadcast %c8_i32 : i32 to vector<8x128xi32>
    %25 = arith.cmpi slt, %23, %24 : vector<8x128xi32>
    %cst_17 = arith.constant -1.000000e+30 : f32
    %26 = vector.broadcast %cst_17 : f32 to vector<8x128xf32>
    %27 = arith.select %25, %22, %26 : vector<8x128xi1>, vector<8x128xf32>
    %cst_18 = arith.constant dense<0xFF800000> : vector<8xf32>
    %28 = vector.multi_reduction <maximumf>, %27, %cst_18 [1] : vector<8x128xf32> to vector<8xf32>
    %29 = vector.shape_cast %28 : vector<8xf32> to vector<8x1xf32>
    %30 = vector.broadcast %29 : vector<8x1xf32> to vector<8x128xf32>
    %31 = arith.subf %27, %30 : vector<8x128xf32>
    %32 = math.exp %31 : vector<8x128xf32>
    %cst_19 = arith.constant dense<0.000000e+00> : vector<8xf32>
    %33 = vector.multi_reduction <add>, %32, %cst_19 [1] : vector<8x128xf32> to vector<8xf32>
    %34 = vector.shape_cast %33 : vector<8xf32> to vector<8x1xf32>
    %35 = vector.broadcast %34 : vector<8x1xf32> to vector<8x128xf32>
    %36 = arith.divf %32, %35 : vector<8x128xf32>
    %37 = vector.extract_strided_slice %36 {offsets = [0, 0], sizes = [8, 8], strides = [1, 1]} : vector<8x128xf32> to vector<8x8xf32>
    %c0_20 = arith.constant 0 : index
    %c0_21 = arith.constant 0 : index
    %38 = vector.load %arg8[%c0_20, %c0_21] : memref<8x8xf32, #tpu.memory_space<vmem>>, vector<8x8xf32>
    tpu.vector_store %arg8[%c0_20, %c0_21], %37 {strides = array<i32>} : memref<8x8xf32, #tpu.memory_space<vmem>>, vector<8x8xf32>,
    %39 = vector.extract_strided_slice %22 {offsets = [0, 8], sizes = [8, 1], strides = [1, 1]} : vector<8x128xf32> to vector<8x1xf32>
    %c0_22 = arith.constant 0 : index
    %c0_23 = arith.constant 0 : index
    %40 = vector.load %arg9[%c0_22, %c0_23] : memref<8x1xf32, #tpu.memory_space<vmem>>, vector<8x1xf32>
    tpu.vector_store %arg9[%c0_22, %c0_23], %39 {strides = array<i32>} : memref<8x1xf32, #tpu.memory_space<vmem>>, vector<8x1xf32>,
    return
  }
  func.func @transform_0(%arg0: i32) -> (i32, i32) {
    %c0_i32 = arith.constant 0 : i32
    %c0_i32_0 = arith.constant 0 : i32
    return %arg0, %c0_i32 : i32, i32
  }
  func.func @transform_1(%arg0: i32) -> (i32, i32) {
    %c0_i32 = arith.constant 0 : i32
    %c0_i32_0 = arith.constant 0 : i32
    %c0_i32_1 = arith.constant 0 : i32
    return %c0_i32, %c0_i32_0 : i32, i32
  }
  func.func @transform_2(%arg0: i32) -> (i32, i32) {
    %c0_i32 = arith.constant 0 : i32
    %c0_i32_0 = arith.constant 0 : i32
    %c0_i32_1 = arith.constant 0 : i32
    return %c0_i32, %c0_i32_0 : i32, i32
  }
  func.func @transform_3(%arg0: i32) -> (i32, i32) {
    %c0_i32 = arith.constant 0 : i32
    %c0_i32_0 = arith.constant 0 : i32
    %c0_i32_1 = arith.constant 0 : i32
    return %c0_i32, %c0_i32_0 : i32, i32
  }
  func.func @transform_4(%arg0: i32) -> (i32, i32) {
    %c0_i32 = arith.constant 0 : i32
    %c0_i32_0 = arith.constant 0 : i32
    %c0_i32_1 = arith.constant 0 : i32
    return %c0_i32, %c0_i32_0 : i32, i32
  }
  func.func @transform_5(%arg0: i32) -> (i32, i32) {
    %c0_i32 = arith.constant 0 : i32
    %c0_i32_0 = arith.constant 0 : i32
    %c0_i32_1 = arith.constant 0 : i32
    return %c0_i32, %c0_i32_0 : i32, i32
  }
  func.func @transform_6(%arg0: i32) -> (i32, i32) {
    %c0_i32 = arith.constant 0 : i32
    %c0_i32_0 = arith.constant 0 : i32
    %c0_i32_1 = arith.constant 0 : i32
    return %c0_i32, %c0_i32_0 : i32, i32
  }
  func.func @transform_7(%arg0: i32) -> (i32, i32) {
    %c0_i32 = arith.constant 0 : i32
    %c0_i32_0 = arith.constant 0 : i32
    return %arg0, %c0_i32 : i32, i32
  }
  func.func @transform_8(%arg0: i32) -> (i32, i32) {
    %c0_i32 = arith.constant 0 : i32
    %c0_i32_0 = arith.constant 0 : i32
    return %arg0, %c0_i32 : i32, i32
  }
}

</mosaic_0001>

<bundles_post_ra>
// kernel: tpu_custom_call.1
= control target key start
LH: loop header
LB: loop body
LE: loop exit
PB: predicated region body
PF: predicated region fallthrough
CT: control target
= control target key end

     0   :  { %14 = vsyncpa [#allocation3], 0  ;;  %s766_s0 = inlined_call_operand.hbm [shape: f32[8,32], index: 0, kind: input, shape index: {}]   ;;  %s767_s1 = inlined_call_operand.hbm [shape: bf16[32,128], index: 1, kind: input, shape index: {}]   ;;  %s768_s2 = inlined_call_operand.vmem [shape: f32[1,128], index: 2, kind: input, shape index: {}]   ;;  %s769_s3 = inlined_call_operand.hbm [shape: bf16[128,128], index: 3, kind: input, shape index: {}]   ;;  %s770_s4 = inlined_call_operand.vmem [shape: f32[1,128], index: 4, kind: input, shape index: {}]   ;;  %s771_s5 = inlined_call_operand.hbm [shape: bf16[128,128], index: 5, kind: input, shape index: {}]   ;;  %s772_s6 = inlined_call_operand.vmem [shape: f32[1,128], index: 6, kind: input, shape index: {}]   ;;  %s773_s7 = inlined_call_operand.hbm [shape: f32[8,8], index: 7, kind: output, shape index: {0}]   ;;  %s774_s8 = inlined_call_operand.vmem [shape: f32[8,1], index: 8, kind: output, shape index: {1}]  }
   0x1   :  { %15 = vsyncpa [#allocation6], 0 }
   0x2   :  { %16 = vsyncpa [#allocation9], 0 }
   0x3   :  { %17 = vsyncpa [#allocation4], 0  ;;  %s651_s27 = smov [#allocation5]  }
   0x4   :  { %s33_s28 = sshll.u32 %s651_s27, 4  ;;  %s34_s28 = int_to_ptr.vmem [resolvable:$true] %s33_s28 }
   0x5   :  { %s551_s29 = scalar_lea.vmem %s34_s28, 256  ;;  %p556_p1 = scmp.lt.s32.totalorder %s34_s28, %s34_s28 }
   0x6   :  { %p552_p0 = scmp.ne.s32.totalorder %s34_s28, %s551_s29  ;;  %p557_p2 = scmp.lt.s32.totalorder %s551_s29, %s551_s29 }
   0x8   :  { %p558_p3 = por %p557_p2, %p556_p1 }
   0xa   :  { %p559_p4 = pnand %p558_p3, %p552_p0 }
   0xc   :  { %562 = shalt.err (!%p559_p4)
}
   0xd   :  { %s652_s30 = smov 64   ;;  %s653_s9 = smov 4  }
   0xe   :  { %39 = dma.hbm_to_vmem [thread:$0]  %s767_s1, 256, %s34_s28, [#allocation6], %s652_s30, %s652_s30, %s653_s9  }
   0xf   :  { %s654_s12 = smov [#allocation2]   ;;  %s655_s14 = smov [#allocation7]  }
  0x10   :  { %s24_s13 = sshll.u32 %s654_s12, 4  ;;  %s47_s15 = sshll.u32 %s655_s14, 4  ;;  %s25_s13 = int_to_ptr.vmem [resolvable:$true] %s24_s13  ;;  %s48_s15 = int_to_ptr.vmem [resolvable:$true] %s47_s15 }
  0x11   :  { %s571_s16 = scalar_lea.vmem %s25_s13, 128  ;;  %p576_p6 = scmp.lt.s32.totalorder %s25_s13, %s25_s13 }
  0x12   :  { %p572_p5 = scmp.ne.s32.totalorder %s25_s13, %s571_s16  ;;  %p577_p7 = scmp.lt.s32.totalorder %s571_s16, %s571_s16 }
  0x14   :  { %p578_p8 = por %p577_p7, %p576_p6 }
  0x16   :  { %p579_p9 = pnand %p578_p8, %p572_p5 }
  0x18   :  { %582 = shalt.err (!%p579_p9)
}
  0x19   :  { %27 = dma.hbm_to_vmem [thread:$0]  %s766_s0, 128, %s25_s13, [#allocation3]  }
  0x1a   :  { %s591_s19 = scalar_lea.vmem %s48_s15, 1024  ;;  %p596_p11 = scmp.lt.s32.totalorder %s48_s15, %s48_s15 }
  0x1b   :  { %p592_p10 = scmp.ne.s32.totalorder %s48_s15, %s591_s19  ;;  %p597_p12 = scmp.lt.s32.totalorder %s591_s19, %s591_s19 }
  0x1d   :  { %p598_p13 = por %p597_p12, %p596_p11 }
  0x1f   :  { %p599_p0 = pnand %p598_p13, %p592_p10 }
  0x21   :  { %602 = shalt.err (!%p599_p0)
}
  0x22   :  { %53 = dma.hbm_to_vmem [thread:$0]  %s769_s3, 1024, %s48_s15, [#allocation6], %s652_s30, %s652_s30, %s653_s9  }
  0x23   :  { %s656_s21 = smov [#allocation8]  }
  0x24   :  { %s61_s22 = sshll.u32 %s656_s21, 4  ;;  %s62_s22 = int_to_ptr.vmem [resolvable:$true] %s61_s22 }
  0x25   :  { %s611_s23 = scalar_lea.vmem %s62_s22, 1024  ;;  %p616_p2 = scmp.lt.s32.totalorder %s62_s22, %s62_s22 }
  0x26   :  { %p612_p1 = scmp.ne.s32.totalorder %s62_s22, %s611_s23  ;;  %p617_p3 = scmp.lt.s32.totalorder %s611_s23, %s611_s23 }
  0x28   :  { %p618_p4 = por %p617_p3, %p616_p2 }
  0x2a   :  { %p619_p5 = pnand %p618_p4, %p612_p1 }
  0x2c   :  { %622 = shalt.err (!%p619_p5)
}
  0x2d   :  { %67 = dma.hbm_to_vmem [thread:$0]  %s771_s5, 1024, %s62_s22, [#allocation9], %s652_s30, %s652_s30, %s653_s9  }
  0x2e   :  { %643 = dma.done.wait [#allocation3], 128  }
  0x2f   :  { %644 = vsyncadd [#allocation3], 4294967168 }
  0x30   :  { %645 = dma.done.wait [#allocation6], 1280  }
  0x31   :  { %646 = vsyncadd [#allocation6], 4294966016 }
  0x32   :  { %647 = dma.done.wait [#allocation9], 1024  }
  0x33   :  { %648 = vsyncadd [#allocation9], 4294966272  ;;  %v657_v0 = vmov 0.0   ;;  %vm658_vm0 = vmmov 0   ;;  %v521_v1 = vld [vmem:[#allocation5 + $0x8] sm:$0xff]   ;;  %v522_v2 = vld [vmem:[#allocation5] sm:$0xff]   ;;  %v378_v37 = vlaneseq }
  0x34   :  { %463 = vmatprep.subr.bf16.mxu0 %v657_v0  ;;  %467 = vmatprep.mubr.msk.bf16.mxu0 %vm658_vm0, %v657_v0  ;;  %v83_v3 = vld [vmem:[#allocation2] sm:$0xff]  ;;  %v523_v4 = vld [vmem:[#allocation7 + $0x38] sm:$0xff]   ;;  %v524_v6 = vld [vmem:[#allocation7 + $0x30] sm:$0xff]   ;;  %vm108_vm1 = vcmask 261120   ;;  %s659_s28 = smov 120   ;;  %vm397_vm3 = vcmask 7168  }
  0x35   :  { %471 = vmatprep.subr.bf16.mxu1 %v657_v0  ;;  %487 = vmatprep.mubr.msk.bf16.mxu1 %vm658_vm0, %v657_v0  ;;  %v84_v5 = vpack.c.bf16 %v83_v3, %v83_v3  ;;  %v525_v7 = vld [vmem:[#allocation7 + $0x28] sm:$0xff]   ;;  %v526_v8 = vld [vmem:[#allocation7 + $0x20] sm:$0xff]   ;;  %v527_v9 = vld [vmem:[#allocation7 + $0x18] sm:$0xff]   ;;  %v379_v38 = vand.u32 127, %v378_v37  ;;  %vm391_vm4 = vcmask 64512  }
  0x36   :  { %464 = vmatpush3.bf16.msra.mxu0 %v521_v1  ;;  %472 = vmatpush3.bf16.msra.mxu1 %v523_v4  ;;  %v528_v10 = vld [vmem:[#allocation7 + $0x10] sm:$0xff]   ;;  %v529_v11 = vld [vmem:[#allocation7 + $0x8] sm:$0xff]   ;;  %v530_v12 = vld [vmem:[#allocation7] sm:$0xff]  }
  0x37   :  { %465 = vmatprep.subr.bf16.mxu0 %v657_v0  ;;  %473 = vmatprep.subr.bf16.mxu1 %v657_v0  ;;  %v531_v13 = vld [vmem:[#allocation8 + $0x38] sm:$0xff]   ;;  %v532_v14 = vld [vmem:[#allocation8 + $0x30] sm:$0xff]   ;;  %v533_v15 = vld [vmem:[#allocation8 + $0x28] sm:$0xff]   ;;  %vm380_vm2 = vcmp.lt.s32.totalorder %v379_v38, 8 }
  0x38   :  { %v534_v16 = vld [vmem:[#allocation8 + $0x20] sm:$0xff]   ;;  %v535_v17 = vld [vmem:[#allocation8 + $0x18] sm:$0xff]   ;;  %v536_v18 = vld [vmem:[#allocation8 + $0x10] sm:$0xff]  }
  0x39   :  { %v420_v19 = vld [vmem:[%s768_s2] ss:$0 sm:$0xff]  ;;  %v538_v28 = vld [vmem:[#allocation8] sm:$0xff]  }
  0x3a   :  { %466 = vmatpush3.bf16.msra.mxu0 %v522_v2  ;;  %474 = vmatpush3.bf16.msra.mxu1 %v524_v6  ;;  %v537_v27 = vld [vmem:[#allocation8 + $0x8] sm:$0xff]  }
  0x3b   :  { %491 = vmatprep.subr.bf16.mxu0 %v657_v0  ;;  %475 = vmatprep.subr.bf16.mxu1 %v657_v0  ;;  %v424_v29 = vld [vmem:[%s770_s4] ss:$0 sm:$0xff] }
  0x3c   :  { %v433_v39 = vld [vmem:[%s772_s6] ss:$0 sm:$0xff]  ;;  %s660_s6 = smov [#allocation10]  }
  0x3d   :  { %468 = vmatmul.mubr.msk.bf16.vlgmr.msra.gmra.mxu0 %vm108_vm1, %v84_v5  ;;  %s405_s30 = sshll.u32 %s660_s6, 4  ;;  %s406_s30 = int_to_ptr.vmem [resolvable:$true] %s405_s30 }
  0x3e   :  { %507 = vmatprep.mubr.msk.bf16.mxu0 %vm658_vm0, %v657_v0  ;;  %476 = vmatpush3.bf16.msra.mxu1 %v525_v7  ;;  %s623_s9 = scalar_lea.vmem %s406_s30, 128  ;;  %p628_p7 = scmp.lt.s32.totalorder %s406_s30, %s406_s30 }
  0x3f   :  { %477 = vmatprep.subr.bf16.mxu1 %v657_v0  ;;  %492 = vmatpush3.bf16.msra.mxu0 %v531_v13  ;;  %p624_p6 = scmp.ne.s32.totalorder %s406_s30, %s623_s9  ;;  %p629_p8 = scmp.lt.s32.totalorder %s623_s9, %s623_s9 }
  0x40   :  { %493 = vmatprep.subr.bf16.mxu0 %v657_v0 }
  0x41   :  { %p630_p9 = por %p629_p8, %p628_p7 }
  0x42   :  { %478 = vmatpush3.bf16.msra.mxu1 %v526_v8 }
  0x43   :  { %479 = vmatprep.subr.bf16.mxu1 %v657_v0  ;;  %494 = vmatpush3.bf16.msra.mxu0 %v532_v14  ;;  %p631_p10 = pnand %p630_p9, %p624_p6 }
  0x44   :  { %495 = vmatprep.subr.bf16.mxu0 %v657_v0 }
  0x46   :  { %480 = vmatpush3.bf16.msra.mxu1 %v527_v9 }
  0x47   :  { %481 = vmatprep.subr.bf16.mxu1 %v657_v0  ;;  %496 = vmatpush3.bf16.msra.mxu0 %v533_v15 }
  0x48   :  { %497 = vmatprep.subr.bf16.mxu0 %v657_v0 }
  0x4a   :  { %482 = vmatpush3.bf16.msra.mxu1 %v528_v10 }
  0x4b   :  { %483 = vmatprep.subr.bf16.mxu1 %v657_v0  ;;  %498 = vmatpush3.bf16.msra.mxu0 %v534_v16 }
  0x4c   :  { %499 = vmatprep.subr.bf16.mxu0 %v657_v0 }
  0x4e   :  { %484 = vmatpush3.bf16.msra.mxu1 %v529_v11 }
  0x4f   :  { %485 = vmatprep.subr.bf16.mxu1 %v657_v0  ;;  %500 = vmatpush3.bf16.msra.mxu0 %v535_v17 }
  0x50   :  { %501 = vmatprep.subr.bf16.mxu0 %v657_v0 }
  0x52   :  { %486 = vmatpush3.bf16.msra.mxu1 %v530_v12 }
  0x53   :  { %502 = vmatpush3.bf16.msra.mxu0 %v536_v18 }
  0x54   :  { %503 = vmatprep.subr.bf16.mxu0 %v657_v0 }
  0x57   :  { %504 = vmatpush3.bf16.msra.mxu0 %v537_v27 }
  0x58   :  { %505 = vmatprep.subr.bf16.mxu0 %v657_v0 }
  0x5b   :  { %506 = vmatpush3.bf16.msra.mxu0 %v538_v28 }
  0xfd   :  { %v146_v20 = vpop.f32.mrf.mxu0 }
  0xfe   :  { %v147_v21 = vadd.f32 %v420_v19, %v146_v20 }
  0xff   :  { %v469_v22 = vpop.f32.mrf.mxu0 }
 0x100   :  { %v152_v23 = vmax.f32 %v147_v21, 0.0 }
 0x101   :  { %v149_v24 = vpop.f32.mrf.mxu0 }
 0x102   :  { %v153_v25 = vpack.c.bf16 %v152_v23, %v152_v23 }
 0x103   :  { %v470_v26 = vpop.f32.mrf.mxu0 }
 0x104   :  { %488 = vmatmul.mubr.bf16.vlgmr.msra.gmra.mxu1 %v153_v25 }
 0x1c4   :  { %v259_v30 = vpop.f32.mrf.mxu1 }
 0x1c5   :  { %v260_v31 = vadd.f32 %v424_v29, %v259_v30 }
 0x1c6   :  { %v489_v32 = vpop.f32.mrf.mxu1 }
 0x1c7   :  { %v265_v33 = vmax.f32 %v260_v31, 0.0 }
 0x1c8   :  { %v262_v34 = vpop.f32.mrf.mxu1 }
 0x1c9   :  { %v266_v35 = vpack.c.bf16 %v265_v33, %v265_v33 }
 0x1ca   :  { %v490_v36 = vpop.f32.mrf.mxu1 }
 0x1cb   :  { %508 = vmatmul.mubr.bf16.vlgmr.msra.gmra.mxu0 %v266_v35 }
 0x28b   :  { %v372_v40 = vpop.f32.mrf.mxu0 }
 0x28c   :  { %v373_v41 = vadd.f32 %v433_v39, %v372_v40 }
 0x28d   :  { %v509_v42 = vpop.f32.mrf.mxu0 }
 0x28e   :  { %394 = vrot.lane.b32.xlu1 %v373_v41, %s659_s28  ;;  %v381_v43 = vsel %vm380_vm2, %v373_v41, -1e+30 }
 0x28f   :  { %382 = vmax.xlane.f32.xlu0 %v381_v43  ;;  %v375_v44 = vpop.f32.mrf.mxu0 }
 0x291   :  { %v510_v45 = vpop.f32.mrf.mxu0 }
 0x300   :  { %v395_v46 = vpop.permute.xlu1 %394 }
 0x301   :  { %398 = vst.msk [vmem:[%s774_s8] sm:$0xff] %vm397_vm3, %v395_v46 }
 0x318   :  { %v383_v47 = vpop.xlane.xlu0 %382 }
 0x319   :  { %v384_v48 = vsub.f32 %v381_v43, %v383_v47 }
 0x31b   :  { %v385_v49 = vmul.f32 1.442695, %v384_v48 }
 0x31d   :  { %539 = vpow2.f32 %v385_v49 }
 0x32a   :  { %v540_v50 = vpop.eup %539 }
 0x32b   :  { %387 = vadd.xlane.f32.xlu0 %v540_v50 }
 0x3b4   :  { %v388_v51 = vpop.xlane.xlu0 %387 }
 0x3b5   :  { %541 = vrcp.f32 %v388_v51 }
 0x3c2   :  { %v542_v52 = vpop.eup %541 }
 0x3c3   :  { %v390_v53 = vmul.f32 %v542_v52, %v540_v50 }
 0x3c5   :  { %392 = vst.msk [vmem:[#allocation10] sm:$0xff] %vm391_vm4, %v390_v53 }
 0x3c6   :  { %634 = shalt.err (!%p631_p10)
}
 0x3c7   :  { %408 = dma.vmem_to_hbm [thread:$0]  %s406_s30, 128, %s773_s7, [#allocation4]  }
 0x3c8   :  { %649 = dma.done.wait [#allocation4], 128  }
 0x3c9   :  { %650 = vsyncadd [#allocation4], 4294967168 }
 0x3ca   :  { %416 = vsyncpa [#allocation3], 1 }
 0x3cb   :  { %417 = vsyncpa [#allocation6], 1 }
 0x3cc   :  { %418 = vsyncpa [#allocation9], 1 }
 0x3cd   :  { %419 = vsyncpa [#allocation4], 1 }

</bundles_post_ra>
